<compile_context>
chip_gen: v5e
topology: v5e:2x2
jax: 0.10.0
libtpu: 0.0.40
codegen_flags: <defaults>
</compile_context>

<pallas_src>
import functools

import jax
import jax.numpy as jnp
from jax.experimental import pallas as pl
from jax.experimental.pallas import tpu as pltpu

EPS = 1e-5          # BatchNorm2d eps
TM_MAX = 256        # output-row (M) tile
TK_MAX = 512        # contraction (taps*Cin) tile
TL_MAX = 1024       # lane tile for the upsample matmuls
VMEM_LIMIT = 48 * 1024 * 1024


# ----------------------------- small helpers ------------------------------

def _round_up(x, m):
    return (x + m - 1) // m * m


def _tile_dim(size, max_tile, align):
    """Pick a tile (multiple of `align`, <= roughly max_tile) and padded size."""
    s = _round_up(max(size, 1), align)
    n = -(-s // max_tile)
    t = _round_up(-(-s // n), align)
    return t, n * t


# ----------------------------- Pallas kernels -----------------------------

def _conv_bn_act_kernel(x_ref, w_ref, scale_ref, shift_ref, *rest,
                        relu: bool, has_res: bool):
    """K-tiled matmul with f32 accumulator; BN(+res)(+ReLU) epilogue on last K."""
    if has_res:
        res_ref, o_ref, acc_ref = rest
    else:
        o_ref, acc_ref = rest
    k = pl.program_id(1)

    @pl.when(k == 0)
    def _():
        acc_ref[...] = jnp.zeros_like(acc_ref)

    acc_ref[...] += jnp.dot(x_ref[...], w_ref[...],
                            preferred_element_type=jnp.float32)

    @pl.when(k == pl.num_programs(1) - 1)
    def _():
        y = acc_ref[...] * scale_ref[...] + shift_ref[...]
        if has_res:
            y = y + res_ref[...]
        if relu:
            y = jnp.maximum(y, 0.0)
        o_ref[...] = y.astype(o_ref.dtype)


def _maxpool_kernel(x_ref, o_ref):
    """Single-pass 9-way max over the tap axis of an (T, tm, C) block."""
    acc = x_ref[0]
    for i in range(1, x_ref.shape[0]):
        acc = jnp.maximum(acc, x_ref[i])
    o_ref[...] = acc


def _rowup_kernel(b_ref, x_ref, o_ref):
    """out[(o), l] = B[(o), (k)] @ x[(k), l]  -- 1-D separable interpolation."""
    o_ref[0] = jnp.dot(b_ref[...], x_ref[0],
                       preferred_element_type=jnp.float32)


# ------------------------------- JAX glue ---------------------------------

def _extract_tap_slices(x, kh, kw, stride, pad, pad_value=0.0):
    """x: (N,H,W,C) -> list of KH*KW slices each (N*Ho*Wo, C). Pure slicing."""
    n, h, w, c = x.shape
    xp = jnp.pad(x, ((0, 0), (pad, pad), (pad, pad), (0, 0)),
                 constant_values=pad_value)
    ho = (h + 2 * pad - kh) // stride + 1
    wo = (w + 2 * pad - kw) // stride + 1
    slices = []
    for i in range(kh):
        for j in range(kw):
            sl = xp[:, i:i + stride * (ho - 1) + 1:stride,
                       j:j + stride * (wo - 1) + 1:stride, :]
            slices.append(sl.reshape(n * ho * wo, c))
    return slices, (n, ho, wo)


def conv_bn_act(x, w, bias, bn, *, stride=1, pad=1, relu=True, residual=None):
    """Fused Conv2d + BatchNorm2d(eval) + optional residual add + optional ReLU."""
    kh, kw, cin, cout = w.shape
    slices, (n, ho, wo) = _extract_tap_slices(x, kh, kw, stride, pad)
    m = n * ho * wo
    k_dim = kh * kw * cin

    # TODO(synk): read shifted NHWC windows straight from HBM inside the kernel
    # (and fuse decoder channel-concats as K-groups) instead of materializing
    # the im2col matrix -- removes the T-times HBM traffic blowup.
    x2d = jnp.concatenate(slices, axis=1)            # (M, KH*KW*Cin), (kh,kw,cin) order
    w2d = w.reshape(k_dim, cout)                      # same (kh,kw,cin) row order

    gamma, beta, mean, var = bn
    scale = gamma / jnp.sqrt(var + EPS)
    shift = beta - mean * scale
    if bias is not None:
        shift = shift + bias * scale

    tm, m_pad = _tile_dim(m, TM_MAX, 16)
    tk, k_pad = _tile_dim(k_dim, TK_MAX, 128)
    cout_pad = _round_up(cout, 128)                   # lane-dense output

    x2d = jnp.pad(x2d, ((0, m_pad - m), (0, k_pad - k_dim))).astype(jnp.bfloat16)
    w2d = jnp.pad(w2d.astype(jnp.float32),
                  ((0, k_pad - k_dim), (0, cout_pad - cout))).astype(jnp.bfloat16)
    scale2 = jnp.pad(scale, (0, cout_pad - cout)).reshape(1, cout_pad).astype(jnp.float32)
    shift2 = jnp.pad(shift, (0, cout_pad - cout)).reshape(1, cout_pad).astype(jnp.float32)

    has_res = residual is not None
    inputs = [x2d, w2d, scale2, shift2]
    in_specs = [
        pl.BlockSpec((tm, tk), lambda i, k: (i, k)),
        pl.BlockSpec((tk, cout_pad), lambda i, k: (k, 0)),
        pl.BlockSpec((1, cout_pad), lambda i, k: (0, 0)),
        pl.BlockSpec((1, cout_pad), lambda i, k: (0, 0)),
    ]
    if has_res:
        res2d = jnp.pad(residual.reshape(m, cout).astype(jnp.float32),
                        ((0, m_pad - m), (0, cout_pad - cout)))
        inputs.append(res2d)
        in_specs.append(pl.BlockSpec((tm, cout_pad), lambda i, k: (i, 0)))

    kernel = functools.partial(_conv_bn_act_kernel, relu=relu, has_res=has_res)
    out = pl.pallas_call(
        kernel,
        out_shape=jax.ShapeDtypeStruct((m_pad, cout_pad), jnp.float32),
        grid=(m_pad // tm, k_pad // tk),
        in_specs=in_specs,
        out_specs=pl.BlockSpec((tm, cout_pad), lambda i, k: (i, 0)),
        scratch_shapes=[pltpu.VMEM((tm, cout_pad), jnp.float32)],
        compiler_params=pltpu.CompilerParams(
            dimension_semantics=("parallel", "arbitrary"),
            vmem_limit_bytes=VMEM_LIMIT),
    )(*inputs)
    return out[:m, :cout].reshape(n, ho, wo, cout)


def maxpool_3x3_s2_p1(x):
    slices, (n, ho, wo) = _extract_tap_slices(x, 3, 3, 2, 1, pad_value=-jnp.inf)
    taps = jnp.stack(slices, axis=0)                  # (T=9, M, C)
    t, m, c = taps.shape
    tm, m_pad = _tile_dim(m, TM_MAX, 8)
    taps = jnp.pad(taps, ((0, 0), (0, m_pad - m), (0, 0)), constant_values=0.0)
    out = pl.pallas_call(
        _maxpool_kernel,
        out_shape=jax.ShapeDtypeStruct((m_pad, c), jnp.float32),
        grid=(m_pad // tm,),
        in_specs=[pl.BlockSpec((t, tm, c), lambda i: (0, i, 0))],
        out_specs=pl.BlockSpec((tm, c), lambda i: (i, 0)),
        compiler_params=pltpu.CompilerParams(
            dimension_semantics=("parallel",),
            vmem_limit_bytes=VMEM_LIMIT),
    )(taps)
    return out[:m].reshape(n, ho, wo, c)


def _interp_matrix(out_size, in_size):
    """Dense 1-D bilinear interpolation matrix, align_corners=True."""
    coords = jnp.arange(out_size, dtype=jnp.float32) * (
        float(in_size - 1) / float(max(out_size - 1, 1)))
    i0 = jnp.clip(jnp.floor(coords).astype(jnp.int32), 0, in_size - 1)
    i1 = jnp.clip(i0 + 1, 0, in_size - 1)
    frac = coords - i0.astype(jnp.float32)
    return ((1.0 - frac)[:, None] * jax.nn.one_hot(i0, in_size, dtype=jnp.float32)
            + frac[:, None] * jax.nn.one_hot(i1, in_size, dtype=jnp.float32))


def _interp_rows(b, x3):
    """x3: (N, K, L) -> (N, O, L), out[n] = b @ x3[n]; lane axis tiled."""
    n, k, l = x3.shape
    o = b.shape[0]
    tl, l_pad = _tile_dim(l, TL_MAX, 128)
    x3p = jnp.pad(x3.astype(jnp.float32), ((0, 0), (0, 0), (0, l_pad - l)))
    out = pl.pallas_call(
        _rowup_kernel,
        out_shape=jax.ShapeDtypeStruct((n, o, l_pad), jnp.float32),
        grid=(n, l_pad // tl),
        in_specs=[pl.BlockSpec((o, k), lambda i, j: (0, 0)),
                  pl.BlockSpec((1, k, tl), lambda i, j: (i, 0, j))],
        out_specs=pl.BlockSpec((1, o, tl), lambda i, j: (i, 0, j)),
        compiler_params=pltpu.CompilerParams(
            dimension_semantics=("parallel", "parallel"),
            vmem_limit_bytes=VMEM_LIMIT),
    )(b.astype(jnp.float32), x3p)
    return out[:, :, :l]


def bilinear_up2(x):
    """nn.Upsample(scale_factor=2, mode='bilinear', align_corners=True), separable."""
    n, h, w, c = x.shape
    if h == 1 and w == 1:
        # degenerate 1x1 -> 2x2: every output pixel equals the single input pixel
        return jnp.tile(x, (1, 2, 2, 1))
    oh, ow = 2 * h, 2 * w
    y = _interp_rows(_interp_matrix(oh, h), x.reshape(n, h, w * c))
    y = jnp.transpose(y.reshape(n, oh, w, c), (0, 2, 1, 3))      # (n, w, oh, c)
    z = _interp_rows(_interp_matrix(ow, w), y.reshape(n, w, oh * c))
    z = z.reshape(n, ow, oh, c)
    return jnp.transpose(z, (0, 2, 1, 3))                        # (n, oh, ow, c)


# --------------------------- parameter creation ----------------------------

class KeyGen:
    def __init__(self, key):
        self._key = key
        self._i = 0

    def __call__(self):
        self._i += 1
        return jax.random.fold_in(self._key, self._i)


def _conv_w(key, kh, kw, cin, cout):
    std = (2.0 / (kh * kw * cin)) ** 0.5
    return std * jax.random.normal(key, (kh, kw, cin, cout), jnp.float32)


def _bias(key, c):
    return 0.01 * jax.random.normal(key, (c,), jnp.float32)


def _bn(key, c):
    k1, k2, k3, k4 = jax.random.split(key, 4)
    gamma = 1.0 + 0.1 * jax.random.normal(k1, (c,), jnp.float32)
    beta = 0.1 * jax.random.normal(k2, (c,), jnp.float32)
    mean = 0.1 * jax.random.normal(k3, (c,), jnp.float32)
    var = 0.5 + jax.random.uniform(k4, (c,), jnp.float32)
    return (gamma, beta, mean, var)


def _make_basic_block(kg, cin, cout, downsample):
    p = {'w1': _conv_w(kg(), 3, 3, cin, cout), 'bn1': _bn(kg(), cout),
         'w2': _conv_w(kg(), 3, 3, cout, cout), 'bn2': _bn(kg(), cout)}
    if downsample:
        p['wd'] = _conv_w(kg(), 1, 1, cin, cout)
        p['bnd'] = _bn(kg(), cout)
    return p


def _make_cbn(kg, inc, mid, outc):
    return {'w1': _conv_w(kg(), 3, 3, inc, mid), 'b1': _bias(kg(), mid),
            'bn1': _bn(kg(), mid),
            'w2': _conv_w(kg(), 3, 3, mid, outc), 'b2': _bias(kg(), outc),
            'bn2': _bn(kg(), outc)}


def _make_up(kg, inc, outc):
    return {'w': _conv_w(kg(), 3, 3, inc, outc), 'b': _bias(kg(), outc),
            'bn': _bn(kg(), outc)}


def init_roadseg_params(key, num_labels):
    kg = KeyGen(key)
    f = [64, 64, 128, 256, 512]
    p = {}
    # encoder (resnet18 topology; synthetic weights, not pretrained)
    p['conv1'] = _conv_w(kg(), 7, 7, 3, f[0])
    p['bn1'] = _bn(kg(), f[0])
    p['layer1'] = [_make_basic_block(kg, 64, 64, False),
                   _make_basic_block(kg, 64, 64, False)]
    p['layer2'] = [_make_basic_block(kg, 64, 128, True),
                   _make_basic_block(kg, 128, 128, False)]
    p['layer3'] = [_make_basic_block(kg, 128, 256, True),
                   _make_basic_block(kg, 256, 256, False)]
    p['layer4'] = [_make_basic_block(kg, 256, 512, True),
                   _make_basic_block(kg, 512, 512, False)]
    # decoder
    p['conv1_1'] = _make_cbn(kg, f[0] * 2, f[0], f[0])
    p['conv2_1'] = _make_cbn(kg, f[1] * 2, f[1], f[1])
    p['conv3_1'] = _make_cbn(kg, f[2] * 2, f[2], f[2])
    p['conv4_1'] = _make_cbn(kg, f[3] * 2, f[3], f[3])
    p['conv1_2'] = _make_cbn(kg, f[0] * 3, f[0], f[0])
    p['conv2_2'] = _make_cbn(kg, f[1] * 3, f[1], f[1])
    p['conv3_2'] = _make_cbn(kg, f[2] * 3, f[2], f[2])
    p['conv1_3'] = _make_cbn(kg, f[0] * 4, f[0], f[0])
    p['conv2_3'] = _make_cbn(kg, f[1] * 4, f[1], f[1])
    p['conv1_4'] = _make_cbn(kg, f[0] * 5, f[0], f[0])
    p['up2_0'] = _make_up(kg, f[1], f[0])
    p['up2_1'] = _make_up(kg, f[1], f[0])
    p['up2_2'] = _make_up(kg, f[1], f[0])
    p['up2_3'] = _make_up(kg, f[1], f[0])
    p['up3_0'] = _make_up(kg, f[2], f[1])
    p['up3_1'] = _make_up(kg, f[2], f[1])
    p['up3_2'] = _make_up(kg, f[2], f[1])
    p['up4_0'] = _make_up(kg, f[3], f[2])
    p['up4_1'] = _make_up(kg, f[3], f[2])
    p['up5_0'] = _make_up(kg, f[4], f[3])
    p['final'] = _make_up(kg, f[0], num_labels)
    return p


# ------------------------------ forward pass -------------------------------

def basic_block_fwd(x, p, stride):
    if 'wd' in p:
        ident = conv_bn_act(x, p['wd'], None, p['bnd'],
                            stride=stride, pad=0, relu=False)
    else:
        ident = x
    h = conv_bn_act(x, p['w1'], None, p['bn1'], stride=stride, pad=1, relu=True)
    return conv_bn_act(h, p['w2'], None, p['bn2'], stride=1, pad=1,
                       relu=True, residual=ident)


def layer_fwd(x, blocks, stride):
    x = basic_block_fwd(x, blocks[0], stride)
    x = basic_block_fwd(x, blocks[1], 1)
    return x


def cbn_fwd(x, p):
    h = conv_bn_act(x, p['w1'], p['b1'], p['bn1'])
    return conv_bn_act(h, p['w2'], p['b2'], p['bn2'])


def up_fwd(x, p):
    u = bilinear_up2(x)
    return conv_bn_act(u, p['w'], p['b'], p['bn'])


def roadseg_forward(rgb_nchw, p):
    # NCHW (torch convention) -> NHWC internally
    x = jnp.transpose(rgb_nchw, (0, 2, 3, 1)).astype(jnp.float32)
    x = conv_bn_act(x, p['conv1'], None, p['bn1'], stride=2, pad=3, relu=True)
    x1_0 = x
    x = maxpool_3x3_s2_p1(x)
    x = layer_fwd(x, p['layer1'], 1); x2_0 = x
    x = layer_fwd(x, p['layer2'], 2); x3_0 = x
    x = layer_fwd(x, p['layer3'], 2); x4_0 = x
    x = layer_fwd(x, p['layer4'], 2); x5_0 = x

    cat = lambda xs: jnp.concatenate(xs, axis=-1)  # channel concat (NHWC)
    x1_1 = cbn_fwd(cat([x1_0, up_fwd(x2_0, p['up2_0'])]), p['conv1_1'])
    x2_1 = cbn_fwd(cat([x2_0, up_fwd(x3_0, p['up3_0'])]), p['conv2_1'])
    x3_1 = cbn_fwd(cat([x3_0, up_fwd(x4_0, p['up4_0'])]), p['conv3_1'])
    x4_1 = cbn_fwd(cat([x4_0, up_fwd(x5_0, p['up5_0'])]), p['conv4_1'])
    x1_2 = cbn_fwd(cat([x1_0, x1_1, up_fwd(x2_1, p['up2_1'])]), p['conv1_2'])
    x2_2 = cbn_fwd(cat([x2_0, x2_1, up_fwd(x3_1, p['up3_1'])]), p['conv2_2'])
    x3_2 = cbn_fwd(cat([x3_0, x3_1, up_fwd(x4_1, p['up4_1'])]), p['conv3_2'])
    x1_3 = cbn_fwd(cat([x1_0, x1_1, x1_2, up_fwd(x2_2, p['up2_2'])]), p['conv1_3'])
    x2_3 = cbn_fwd(cat([x2_0, x2_1, x2_2, up_fwd(x3_2, p['up3_2'])]), p['conv2_3'])
    x1_4 = cbn_fwd(cat([x1_0, x1_1, x1_2, x1_3, up_fwd(x2_3, p['up2_3'])]),
                   p['conv1_4'])
    out = up_fwd(x1_4, p['final'])
    return jnp.transpose(out, (0, 3, 1, 2))  # back to NCHW like the torch module


# ---------------------------------- main -----------------------------------

if __name__ == "__main__":
    key = jax.random.PRNGKey(0)
    num_labels = 2
    # ResNet18 downsamples by 32x; smallest clean input is 32x32.
    rgb = jax.random.normal(jax.random.fold_in(key, 100),
                            (2, 3, 32, 32), jnp.float32)
    params = init_roadseg_params(jax.random.fold_in(key, 1), num_labels)

    out = roadseg_forward(rgb, params)
    out = jax.block_until_ready(out)

    assert out.shape == (2, num_labels, 32, 32), out.shape
    assert bool(jnp.all(jnp.isfinite(out)))
    print("KERNEL_OK")
</pallas_src>

<mosaic_0001>
module attributes {stable_mosaic.version = 11 : i64} {
  func.func @_conv_bn_act_kernel(%arg0: i32, %arg1: i32, %arg2: memref<256x256xbf16, #tpu.memory_space<vmem>>, %arg3: memref<256x128xbf16, #tpu.memory_space<vmem>>, %arg4: memref<1x128xf32, #tpu.memory_space<vmem>>, %arg5: memref<1x128xf32, #tpu.memory_space<vmem>>, %arg6: memref<256x128xf32, #tpu.memory_space<vmem>>, %arg7: memref<256x128xf32, #tpu.memory_space<vmem>>) attributes {dimension_semantics = [#tpu.dimension_semantics<parallel>, #tpu.dimension_semantics<arbitrary>], iteration_bounds = array<i64: 2, 1>, scalar_prefetch = 0 : i64, scratch_operands = 1 : i64, tpu.core_type = #tpu.core_type<tc>, window_params = [{transform_indices = @transform_0, window_bounds = array<i64: 256, 256>}, {transform_indices = @transform_1, window_bounds = array<i64: 256, 128>}, {pipeline_mode = #tpu.pipeline_mode<synchronous>, transform_indices = @transform_2, window_bounds = array<i64: 1, 128>}, {pipeline_mode = #tpu.pipeline_mode<synchronous>, transform_indices = @transform_3, window_bounds = array<i64: 1, 128>}, {transform_indices = @transform_4, window_bounds = array<i64: 256, 128>}]} {
    %c0_i32 = arith.constant 0 : i32
    %0 = arith.cmpi eq, %arg1, %c0_i32 : i32
    %1 = arith.extui %0 : i1 to i32
    %c0_i32_0 = arith.constant 0 : i32
    %2 = arith.cmpi ne, %1, %c0_i32_0 : i32
    scf.if %2 {
      %cst_10 = arith.constant 0.000000e+00 : f32
      %12 = vector.broadcast %cst_10 : f32 to vector<256x128xf32>
      %c0_11 = arith.constant 0 : index
      %c0_12 = arith.constant 0 : index
      %13 = vector.load %arg7[%c0_11, %c0_12] : memref<256x128xf32, #tpu.memory_space<vmem>>, vector<256x128xf32>
      tpu.vector_store %arg7[%c0_11, %c0_12], %12 {strides = array<i32>} : memref<256x128xf32, #tpu.memory_space<vmem>>, vector<256x128xf32>,
    } else {
    }
    %c0 = arith.constant 0 : index
    %c0_1 = arith.constant 0 : index
    %3 = vector.load %arg7[%c0, %c0_1] : memref<256x128xf32, #tpu.memory_space<vmem>>, vector<256x128xf32>
    %c0_2 = arith.constant 0 : index
    %c0_3 = arith.constant 0 : index
    %4 = vector.load %arg2[%c0_2, %c0_3] : memref<256x256xbf16, #tpu.memory_space<vmem>>, vector<256x256xbf16>
    %c0_4 = arith.constant 0 : index
    %c0_5 = arith.constant 0 : index
    %5 = vector.load %arg3[%c0_4, %c0_5] : memref<256x128xbf16, #tpu.memory_space<vmem>>, vector<256x128xbf16>
    %cst = arith.constant dense<0.000000e+00> : vector<256x128xf32>
    %6 = tpu.matmul %4, %5, %cst {dimension_numbers = #tpu.dot_dimension_numbers<[1], [0], [0], [1], [0, 0, 1, 1], [], []>} : vector<256x256xbf16>, vector<256x128xbf16>, vector<256x128xf32> -> vector<256x128xf32>
    %7 = arith.addf %3, %6 : vector<256x128xf32>
    %c0_6 = arith.constant 0 : index
    %c0_7 = arith.constant 0 : index
    %8 = vector.load %arg7[%c0_6, %c0_7] : memref<256x128xf32, #tpu.memory_space<vmem>>, vector<256x128xf32>
    tpu.vector_store %arg7[%c0_6, %c0_7], %7 {strides = array<i32>} : memref<256x128xf32, #tpu.memory_space<vmem>>, vector<256x128xf32>,
    %c0_i32_8 = arith.constant 0 : i32
    %9 = arith.cmpi eq, %arg1, %c0_i32_8 : i32
    %10 = arith.extui %9 : i1 to i32
    %c0_i32_9 = arith.constant 0 : i32
    %11 = arith.cmpi ne, %10, %c0_i32_9 : i32
    scf.if %11 {
      %c0_10 = arith.constant 0 : index
      %c0_11 = arith.constant 0 : index
      %12 = vector.load %arg7[%c0_10, %c0_11] : memref<256x128xf32, #tpu.memory_space<vmem>>, vector<256x128xf32>
      %c0_12 = arith.constant 0 : index
      %c0_13 = arith.constant 0 : index
      %13 = vector.load %arg4[%c0_12, %c0_13] : memref<1x128xf32, #tpu.memory_space<vmem>>, vector<1x128xf32>
      %14 = vector.broadcast %13 : vector<1x128xf32> to vector<256x128xf32>
      %15 = arith.mulf %12, %14 : vector<256x128xf32>
      %c0_14 = arith.constant 0 : index
      %c0_15 = arith.constant 0 : index
      %16 = vector.load %arg5[%c0_14, %c0_15] : memref<1x128xf32, #tpu.memory_space<vmem>>, vector<1x128xf32>
      %17 = vector.broadcast %16 : vector<1x128xf32> to vector<256x128xf32>
      %18 = arith.addf %15, %17 : vector<256x128xf32>
      %cst_16 = arith.constant 0.000000e+00 : f32
      %19 = vector.broadcast %cst_16 : f32 to vector<256x128xf32>
      %20 = arith.maximumf %18, %19 : vector<256x128xf32>
      %c0_17 = arith.constant 0 : index
      %c0_18 = arith.constant 0 : index
      %21 = vector.load %arg6[%c0_17, %c0_18] : memref<256x128xf32, #tpu.memory_space<vmem>>, vector<256x128xf32>
      tpu.vector_store %arg6[%c0_17, %c0_18], %20 {strides = array<i32>} : memref<256x128xf32, #tpu.memory_space<vmem>>, vector<256x128xf32>,
    } else {
    }
    return
  }
  func.func @transform_0(%arg0: i32, %arg1: i32) -> (i32, i32) {
    %c0_i32 = arith.constant 0 : i32
    return %arg0, %arg1 : i32, i32
  }
  func.func @transform_1(%arg0: i32, %arg1: i32) -> (i32, i32) {
    %c0_i32 = arith.constant 0 : i32
    %c0_i32_0 = arith.constant 0 : i32
    return %arg1, %c0_i32 : i32, i32
  }
  func.func @transform_2(%arg0: i32, %arg1: i32) -> (i32, i32) {
    %c0_i32 = arith.constant 0 : i32
    %c0_i32_0 = arith.constant 0 : i32
    %c0_i32_1 = arith.constant 0 : i32
    return %c0_i32, %c0_i32_0 : i32, i32
  }
  func.func @transform_3(%arg0: i32, %arg1: i32) -> (i32, i32) {
    %c0_i32 = arith.constant 0 : i32
    %c0_i32_0 = arith.constant 0 : i32
    %c0_i32_1 = arith.constant 0 : i32
    return %c0_i32, %c0_i32_0 : i32, i32
  }
  func.func @transform_4(%arg0: i32, %arg1: i32) -> (i32, i32) {
    %c0_i32 = arith.constant 0 : i32
    %c0_i32_0 = arith.constant 0 : i32
    return %arg0, %c0_i32 : i32, i32
  }
}

</mosaic_0001>

<bundles_post_ra>
// kernel: tpu_custom_call.1
= control target key start
LH: loop header
LB: loop body
LE: loop exit
PB: predicated region body
PF: predicated region fallthrough
CT: control target
= control target key end

     0   :  { %s2043_s0 = inlined_call_operand.hbm [shape: bf16[512,256], index: 0, kind: input, shape index: {}]   ;;  %s2044_s1 = inlined_call_operand.hbm [shape: bf16[256,128], index: 1, kind: input, shape index: {}]   ;;  %s2045_s2 = inlined_call_operand.vmem [shape: f32[1,128], index: 2, kind: input, shape index: {}]   ;;  %s2046_s3 = inlined_call_operand.vmem [shape: f32[1,128], index: 3, kind: input, shape index: {}]   ;;  %s2047_s4 = inlined_call_operand.hbm [shape: f32[512,128], index: 4, kind: output, shape index: {}]  }
   0x1   :  { %2049 = sst [smem:[#allocation13_spill]] %s2044_s1 }
   0x2   :  { %9 = vsyncpa [#allocation4], 0 }
   0x3   :  { %11 = vsyncpa [#allocation4 + $0x1], 0 }
   0x4   :  { %12 = vsyncpa [#allocation7], 0 }
   0x5   :  { %13 = vsyncpa [#allocation5], 0 }
   0x6   :  { %15 = vsyncpa [#allocation5 + $0x1], 0  ;;  %s1715_s15 = smov 0   ;;  %s1717_s16 = smov 0  }
   0x7   :  { %s1719_s17 = smov 0   ;;  %s1721_s18 = smov 0  }
   0x8   :  { %s1723_s19 = smov 0   ;;  %s1725_s20 = smov 0  }
   0x9 LB: > { %s1177_s21 = sadd.s32 4294967295, %s1681_s20   ;;  %s1178_s22 = sadd.s32 4294967294, %s1681_s20   ;;  %s1681_s20 = sphi %s1725_s20, %s21_s20   ;;  %s1677_s19 = sphi %s1723_s19, %s2064_s19   ;;  %s1673_s18 = sphi %s1721_s18, %s2063_s18   ;;  %s1669_s17 = sphi %s1719_s17, %s2062_s17   ;;  %s1665_s16 = sphi %s1717_s16, %s2061_s16   ;;  %s1661_s15 = sphi %s1715_s15, %s2060_s15  }
   0xa   : > { %p55_p0 = scmp.ne.s32.totalorder %s1665_s16, %s1661_s15  ;;  %p1749_p1 = scmp.eq.s32.totalorder %s1177_s21, 0 }
   0xb   : > { %p1753_p2 = scmp.eq.s32.totalorder %s1177_s21, 1  ;;  %p153_p3 = scmp.eq.s32.totalorder %s1178_s22, 1 }
   0xc   : > { %p1759_p4 = por %p1749_p1, %p55_p0  ;;  %p1179_p5 = scmp.ge.s32.totalorder %s1681_s20, 1 }
   0xd   : > { %p1764_p6 = por %p153_p3, %p55_p0  ;;  %p160_p7 = scmp.lt.s32.totalorder %s1681_s20, 3 }
   0xe   : > { %s2054_s1 = sld [smem:[#allocation13_spill]]  ;;  %s1683_s5 = smov [#allocation6]  }
   0xf   : > { %p1772_p8 = pnand %p1179_p5, %p160_p7  ;;  %s176_s6 = sshll.u32 %s1683_s5, 4  ;;  %s177_s6 = int_to_ptr.vmem [resolvable:$true] %s176_s6 }
  0x10   : > { %p1181_p11 = scmp.ge.s32.totalorder %s1681_s20, 2  ;;  %s1684_s7 = smov 64  }
  0x11   : > { %p1462_p9 = pneg %p1772_p8  ;;  %s1685_s8 = smov 4  }
  0x12   : > { %s33_s9 = sadd.s32 1, %s1677_s19  ;;  %s42_s10 = sadd.s32 1, %s1669_s17 }
  0x13   : > { %p1463_p10 = pnand %p1462_p9, %p1749_p1  ;;  %p35_p12 = scmp.ge.s32.totalorder %s33_s9, 2 }
  0x14   : > { %s174_s29 = sshll.u32 %s2054_s1, 4  ;;  %p49_p13 = scmp.ne.s32.totalorder %s1669_s17, %s1665_s16  ;;  %s175_s29 = int_to_ptr.hbm [resolvable:$true] %s174_s29 }
  0x15   : > { %1465 = dma.hbm_to_vmem [thread:$0]  (!%p1463_p10), %s175_s29, 2048, %s177_s6, [#allocation7], %s1684_s7, %s1684_s7, %s1685_s8  }
  0x16   : > { %p50_p0 = scmp.eq.s32.totalorder %s1681_s20, 0  ;;  %s2066_s9 = smov (%p35_p12, %s33_s9), 0 }
  0x17   : > { %2056 = sst [smem:[#allocation12_spill]] %s2066_s9  ;;  %p1794_p5 = por %p1753_p2, %p49_p13 }
  0x18   : > { %p1788_p3 = por %p50_p0, %p49_p13  ;;  %s37_s13 = ssub.s32 %s1677_s19, %s2066_s9 }
  0x19   : > { %p1475_p7 = scmp.lt.s32.totalorder %s1681_s20, 2  ;;  %p40_p9 = scmp.eq.s32.totalorder %s37_s13, 0 }
  0x1a   : > { %s196_s14 = sand.u32 1, %s1669_s17   ;;  %s1388_s27 = sshll.u32 %s1677_s19, 8 }
  0x1b   : > { %s1182_s21 = sshll.u32 %s196_s14, 8  ;;  %s208_s5 = scalar_lea.hbm %s2043_s0, %s1388_s27 }
  0x1c   : > { %s1803_s22 = scalar_select %p40_p9, %s1669_s17, %s42_s10  }
  0x1d   : > { %s200_s6 = scalar_lea.vmem [#allocation3], %s1182_s21  ;;  %s209_s24 = sshll.u32 %s208_s5, 4  ;;  %s210_s24 = int_to_ptr.hbm [resolvable:$true] %s209_s24 }
  0x1e   : > { %s211_s7 = sshll.u32 %s200_s6, 4  ;;  %p1467_p2 = pnand %p1475_p7, %p1788_p3  ;;  %s212_s7 = int_to_ptr.vmem [resolvable:$true] %s211_s7 }
  0x1f   : > { %s197_s8 = scalar_lea.sflag [#allocation4], %s196_s14  ;;  %s1686_s1 = smov 128  }
  0x20   : > { %s1687_s9 = smov 8   ;;  %223 = sbr.rel (%p1772_p8) target bundleno = 337 (0x151), region = 36 }
  0x21   : > { %1469 = dma.hbm_to_vmem [thread:$0]  (!%p1467_p2), %s210_s24, 4096, %s212_s7, %s197_s8, %s1686_s1, %s1686_s1, %s1687_s9  }
  0x22   : > { %s1814_s10 = sand.u32 (!%p1772_p8), 1, %s1665_s16  }
  0x23   : > { %s1187_s13 = sshll.u32 (!%p1772_p8), %s1814_s10, 8  ;;  %s226_s21 = scalar_lea.sflag (!%p1772_p8), [#allocation4], %s1814_s10 }
  0x24   : > { %s1820_s27 = scalar_lea.vmem (!%p1772_p8), [#allocation3], %s1187_s13 }
  0x25   : > { %1648 = dma.done.wait (%p1759_p4), %s226_s21, 4096  }
  0x26   : > { %1650 = vsyncadd (%p1759_p4), %s226_s21, 4294963200 }
  0x27   : > { %1652 = dma.done.wait (%p1749_p1), [#allocation7], 2048  }
  0x28   : > { %1654 = vsyncadd (%p1749_p1), [#allocation7], 4294965248  ;;  %v1428_v0 = vld [vmem:[#allocation6 + $0x38] sm:$0xff]  ;;  %v1427_v2 = vld [vmem:[#allocation6 + $0x30] sm:$0xff]  ;;  %s1908_s9 = scalar_lea.vmem [#allocation8], %s1187_s13  ;;  %s1437_s11 = sshll.u32 %s1673_s18, 8 }
  0x29   : > { %v1436_v1 = vld [vmem:[#allocation6 + $0x78] sm:$0xff]  ;;  %652 = vmatpush.bf16.msra.mxu0 %v1428_v0  ;;  %1438 = vmatpush.bf16.msra.mxu2 %v1428_v0  ;;  %v1435_v3 = vld [vmem:[#allocation6 + $0x70] sm:$0xff]  ;;  %v1426_v4 = vld [vmem:[#allocation6 + $0x28] sm:$0xff]  ;;  %s1077_s29 = scalar_lea.hbm %s2047_s4, %s1437_s11  ;;  %s1078_s5 = sshll.u32 %s1908_s9, 4  ;;  %s1079_s5 = int_to_ptr.vmem [resolvable:$true] %s1078_s5 }
  0x2a   : > { %741 = vmatpush.bf16.msra.mxu1 %v1436_v1  ;;  %1446 = vmatpush.bf16.msra.mxu3 %v1436_v1  ;;  %v1434_v5 = vld [vmem:[#allocation6 + $0x68] sm:$0xff]  ;;  %v1425_v6 = vld [vmem:[#allocation6 + $0x20] sm:$0xff]  ;;  %v1424_v8 = vld [vmem:[#allocation6 + $0x18] sm:$0xff]  ;;  %s1080_s18 = sshll.u32 %s1077_s29, 4  ;;  %s1066_s6 = scalar_lea.sflag [#allocation5], %s1814_s10  ;;  %s1081_s18 = int_to_ptr.hbm [resolvable:$true] %s1080_s18 }
  0x2b   : > { %v1433_v7 = vld [vmem:[#allocation6 + $0x60] sm:$0xff]  ;;  %v1432_v9 = vld [vmem:[#allocation6 + $0x58] sm:$0xff]  ;;  %v1423_v10 = vld [vmem:[#allocation6 + $0x10] sm:$0xff]  ;;  %s1609_s7 = sshra.s32 %s1081_s18, 4  ;;  %s1615_s21 = scalar_lea.hbm %s2047_s4, 512  ;;  %s1610_s7 = int_to_ptr.hbm [resolvable:$true] %s1609_s7 }
  0x2c   : > { %v1431_v11 = vld [vmem:[#allocation6 + $0x50] sm:$0xff]  ;;  %v1422_v12 = vld [vmem:[#allocation6 + $0x8] sm:$0xff]  ;;  %v1421_v14 = vld [vmem:[#allocation6] sm:$0xff]  ;;  %s1611_s24 = scalar_lea.hbm %s1610_s7, 256  ;;  %p1616_p10 = scmp.lt.s32.totalorder %s1610_s7, %s2047_s4 }
  0x2d   : > { %653 = vmatpush.bf16.msra.mxu0 %v1427_v2  ;;  %1439 = vmatpush.bf16.msra.mxu2 %v1427_v2  ;;  %v1430_v13 = vld [vmem:[#allocation6 + $0x48] sm:$0xff]  ;;  %v1429_v15 = vld [vmem:[#allocation6 + $0x40] sm:$0xff]  ;;  %v1200_v28 = vld [vmem:[%s1820_s27 + $0x10] sm:$0xf]  ;;  %p1612_p1 = scmp.ne.s32.totalorder %s1610_s7, %s1611_s24  ;;  %p1617_p12 = scmp.lt.s32.totalorder %s1615_s21, %s1611_s24 }
  0x2e   : > { %742 = vmatpush.bf16.msra.mxu1 %v1435_v3  ;;  %1447 = vmatpush.bf16.msra.mxu3 %v1435_v3  ;;  %v1192_v16 = vld [vmem:[%s1820_s27] sm:$0xf]  ;;  %v1390_v17 = vld [vmem:[%s1820_s27 + $0x4] sm:$0xf0]  ;;  %v1389_v20 = vld [vmem:[%s1820_s27 + $0x4] sm:$0xf] }
  0x2f   : > { %v1256_v18 = vld [vmem:[%s1820_s27 + $0x80] sm:$0xf]  ;;  %v1406_v19 = vld [vmem:[%s1820_s27 + $0x84] sm:$0xf0]  ;;  %v1194_v21 = vld [vmem:[%s1820_s27 + $0x8] sm:$0xf0]  ;;  %v1193_v24 = vor.u32 %v1390_v17, %v1192_v16  ;;  %p1613_p4 = pnand %p1612_p1, %p1794_p5  ;;  %p1618_p13 = por %p1617_p12, %p1616_p10 }
  0x30   : > { %v1405_v22 = vld [vmem:[%s1820_s27 + $0x84] sm:$0xf]  ;;  %v1258_v23 = vld [vmem:[%s1820_s27 + $0x88] sm:$0xf0]  ;;  %v1257_v25 = vor.u32 %v1406_v19, %v1256_v18  ;;  %v1197_v26 = vor.u32 %v1389_v20, %v1194_v21  ;;  %v1392_v29 = vld [vmem:[%s1820_s27 + $0x14] sm:$0xf0] }
  0x31   : > { %654 = vmatpush.bf16.msra.mxu0 %v1426_v4  ;;  %1440 = vmatpush.bf16.msra.mxu2 %v1426_v4  ;;  %v1261_v27 = vor.u32 %v1405_v22, %v1258_v23  ;;  %v1264_v30 = vld [vmem:[%s1820_s27 + $0x90] sm:$0xf]  ;;  %v1408_v31 = vld [vmem:[%s1820_s27 + $0x94] sm:$0xf0]  ;;  %v1391_v32 = vld [vmem:[%s1820_s27 + $0x14] sm:$0xf]  ;;  %v1201_v36 = vor.u32 %v1392_v29, %v1200_v28  ;;  %p1614_p8 = pneg %p1613_p4 }
  0x32   : > { %743 = vmatpush.bf16.msra.mxu1 %v1434_v5  ;;  %1448 = vmatpush.bf16.msra.mxu3 %v1434_v5  ;;  %v1202_v33 = vld [vmem:[%s1820_s27 + $0x18] sm:$0xf0]  ;;  %v1407_v34 = vld [vmem:[%s1820_s27 + $0x94] sm:$0xf]  ;;  %v1265_v37 = vor.u32 %v1408_v31, %v1264_v30  ;;  %v1208_v40 = vld [vmem:[%s1820_s27 + $0x20] sm:$0xf] }
  0x33   : > { %v1266_v35 = vld [vmem:[%s1820_s27 + $0x98] sm:$0xf0]  ;;  %v1205_v38 = vor.u32 %v1391_v32, %v1202_v33  ;;  %v1394_v41 = vld [vmem:[%s1820_s27 + $0x24] sm:$0xf0]  ;;  %v1272_v42 = vld [vmem:[%s1820_s27 + $0xa0] sm:$0xf]  ;;  %p1619_p0 = pnand %p1618_p13, %p1614_p8 }
  0x34   : > { %v1269_v39 = vor.u32 %v1407_v34, %v1266_v35  ;;  %v1410_v43 = vld [vmem:[%s1820_s27 + $0xa4] sm:$0xf0]  ;;  %v1393_v44 = vld [vmem:[%s1820_s27 + $0x24] sm:$0xf]  ;;  %v1210_v45 = vld [vmem:[%s1820_s27 + $0x28] sm:$0xf0]  ;;  %v1209_v48 = vor.u32 %v1394_v41, %v1208_v40 }
  0x35   : > { %655 = vmatpush.bf16.msra.mxu0 %v1425_v6  ;;  %1441 = vmatpush.bf16.msra.mxu2 %v1425_v6  ;;  %v1409_v46 = vld [vmem:[%s1820_s27 + $0xa4] sm:$0xf]  ;;  %v1274_v47 = vld [vmem:[%s1820_s27 + $0xa8] sm:$0xf0]  ;;  %v1273_v49 = vor.u32 %v1410_v43, %v1272_v42  ;;  %v1213_v50 = vor.u32 %v1393_v44, %v1210_v45  ;;  %v1216_v52 = vld [vmem:[%s1820_s27 + $0x30] sm:$0xf] }
  0x36   : > { %744 = vmatpush.bf16.msra.mxu1 %v1433_v7  ;;  %1449 = vmatpush.bf16.msra.mxu3 %v1433_v7  ;;  %v1277_v51 = vor.u32 %v1409_v46, %v1274_v47  ;;  %v1396_v53 = vld [vmem:[%s1820_s27 + $0x34] sm:$0xf0]  ;;  %v1280_v54 = vld [vmem:[%s1820_s27 + $0xb0] sm:$0xf]  ;;  %v1395_v56 = vld [vmem:[%s1820_s27 + $0x34] sm:$0xf] }
  0x37   : > { %v1412_v55 = vld [vmem:[%s1820_s27 + $0xb4] sm:$0xf0]  ;;  %v1218_v57 = vld [vmem:[%s1820_s27 + $0x38] sm:$0xf0]  ;;  %v1411_v58 = vld [vmem:[%s1820_s27 + $0xb4] sm:$0xf]  ;;  %v1217_v60 = vor.u32 %v1396_v53, %v1216_v52 }
  0x38   : > { %v1282_v59 = vld [vmem:[%s1820_s27 + $0xb8] sm:$0xf0]  ;;  %v1281_v61 = vor.u32 %v1412_v55, %v1280_v54  ;;  %v1221_v62 = vor.u32 %v1395_v56, %v1218_v57  ;;  %v1224_v0 = vld [vmem:[%s1820_s27 + $0x40] sm:$0xf]  ;;  %v1398_v1 = vld [vmem:[%s1820_s27 + $0x44] sm:$0xf0] }
  0x39   : > { %656 = vmatpush.bf16.msra.mxu0 %v1424_v8  ;;  %1442 = vmatpush.bf16.msra.mxu2 %v1424_v8  ;;  %v1285_v63 = vor.u32 %v1411_v58, %v1282_v59  ;;  %v1288_v2 = vld [vmem:[%s1820_s27 + $0xc0] sm:$0xf]  ;;  %v1414_v3 = vld [vmem:[%s1820_s27 + $0xc4] sm:$0xf0]  ;;  %v1397_v4 = vld [vmem:[%s1820_s27 + $0x44] sm:$0xf]  ;;  %v1225_v8 = vor.u32 %v1398_v1, %v1224_v0 }
  0x3a   : > { %745 = vmatpush.bf16.msra.mxu1 %v1432_v9  ;;  %1450 = vmatpush.bf16.msra.mxu3 %v1432_v9  ;;  %v1226_v5 = vld [vmem:[%s1820_s27 + $0x48] sm:$0xf0]  ;;  %v1413_v6 = vld [vmem:[%s1820_s27 + $0xc4] sm:$0xf]  ;;  %v1289_v9 = vor.u32 %v1414_v3, %v1288_v2  ;;  %v1399_v16 = vld [vmem:[%s1820_s27 + $0x54] sm:$0xf] }
  0x3b   : > { %v1290_v7 = vld [vmem:[%s1820_s27 + $0xc8] sm:$0xf0]  ;;  %v1234_v17 = vld [vmem:[%s1820_s27 + $0x58] sm:$0xf0]  ;;  %v1415_v18 = vld [vmem:[%s1820_s27 + $0xd4] sm:$0xf] }
  0x3c   : > { %v1298_v19 = vld [vmem:[%s1820_s27 + $0xd8] sm:$0xf0]  ;;  %v1237_v22 = vor.u32 %v1399_v16, %v1234_v17  ;;  %v1401_v28 = vld [vmem:[%s1820_s27 + $0x64] sm:$0xf]  ;;  %v1242_v29 = vld [vmem:[%s1820_s27 + $0x68] sm:$0xf0] }
  0x3d   : > { %657 = vmatpush.bf16.msra.mxu0 %v1423_v10  ;;  %1443 = vmatpush.bf16.msra.mxu2 %v1423_v10  ;;  %v1229_v10 = vor.u32 %v1397_v4, %v1226_v5  ;;  %v1301_v23 = vor.u32 %v1415_v18, %v1298_v19  ;;  %v1417_v30 = vld [vmem:[%s1820_s27 + $0xe4] sm:$0xf]  ;;  %v1306_v31 = vld [vmem:[%s1820_s27 + $0xe8] sm:$0xf0]  ;;  %v1245_v34 = vor.u32 %v1401_v28, %v1242_v29  ;;  %v1403_v40 = vld [vmem:[%s1820_s27 + $0x74] sm:$0xf] }
  0x3e   : > { %746 = vmatpush.bf16.msra.mxu1 %v1431_v11  ;;  %1451 = vmatpush.bf16.msra.mxu3 %v1431_v11  ;;  %v1293_v11 = vor.u32 %v1413_v6, %v1290_v7  ;;  %v1309_v35 = vor.u32 %v1417_v30, %v1306_v31  ;;  %v1250_v41 = vld [vmem:[%s1820_s27 + $0x78] sm:$0xf0]  ;;  %v1419_v42 = vld [vmem:[%s1820_s27 + $0xf4] sm:$0xf]  ;;  %v1902_v52 = vld [vmem:[%s2046_s3] ss:$0 sm:$0xff] }
  0x3f   : > { %v1314_v43 = vld [vmem:[%s1820_s27 + $0xf8] sm:$0xf0]  ;;  %v1253_v46 = vor.u32 %v1403_v40, %v1250_v41 }
  0x40   : > { %v1317_v47 = vor.u32 %v1419_v42, %v1314_v43 }
  0x41   : > { %658 = vmatpush.bf16.msra.mxu0 %v1422_v12  ;;  %1444 = vmatpush.bf16.msra.mxu2 %v1422_v12  ;;  %v1232_v12 = vld [vmem:[%s1820_s27 + $0x50] sm:$0xf] }
  0x42   : > { %747 = vmatpush.bf16.msra.mxu1 %v1430_v13  ;;  %1452 = vmatpush.bf16.msra.mxu3 %v1430_v13  ;;  %v1400_v13 = vld [vmem:[%s1820_s27 + $0x54] sm:$0xf0] }
  0x43   : > { %v1233_v20 = vor.u32 %v1400_v13, %v1232_v12 }
  0x45   : > { %659 = vmatpush.bf16.msra.mxu0 %v1421_v14  ;;  %1445 = vmatpush.bf16.msra.mxu2 %v1421_v14  ;;  %v1296_v14 = vld [vmem:[%s1820_s27 + $0xd0] sm:$0xf] }
  0x46   : > { %748 = vmatpush.bf16.msra.mxu1 %v1429_v15  ;;  %1453 = vmatpush.bf16.msra.mxu3 %v1429_v15  ;;  %v1416_v15 = vld [vmem:[%s1820_s27 + $0xd4] sm:$0xf0] }
  0x47   : > { %v1297_v21 = vor.u32 %v1416_v15, %v1296_v14 }
  0x48   : > { %660 = vmatmul.bf16.vlgmr.msra.gmra.mxu0 %v1193_v24  ;;  %700 = vmatmul.bf16.vlgmr.msra.gmra.mxu2 %v1257_v25  ;;  %v1240_v24 = vld [vmem:[%s1820_s27 + $0x60] sm:$0xf]  ;;  %v1402_v25 = vld [vmem:[%s1820_s27 + $0x64] sm:$0xf0] }
  0x49   : > { %749 = vmatmul.bf16.vlgmr.msra.gmra.mxu1 %v1197_v26  ;;  %789 = vmatmul.bf16.vlgmr.msra.gmra.mxu3 %v1261_v27  ;;  %v1304_v26 = vld [vmem:[%s1820_s27 + $0xe0] sm:$0xf]  ;;  %v1418_v27 = vld [vmem:[%s1820_s27 + $0xe4] sm:$0xf0]  ;;  %v1241_v32 = vor.u32 %v1402_v25, %v1240_v24 }
  0x4a   : > { %v1305_v33 = vor.u32 %v1418_v27, %v1304_v26 }
  0x58   : > { %665 = vmatmul.bf16.gmra.mxu0 %v1201_v36  ;;  %705 = vmatmul.bf16.gmra.mxu2 %v1265_v37  ;;  %v1248_v36 = vld [vmem:[%s1820_s27 + $0x70] sm:$0xf]  ;;  %v1404_v37 = vld [vmem:[%s1820_s27 + $0x74] sm:$0xf0] }
  0x59   : > { %754 = vmatmul.bf16.gmra.mxu1 %v1205_v38  ;;  %794 = vmatmul.bf16.gmra.mxu3 %v1269_v39  ;;  %v1312_v38 = vld [vmem:[%s1820_s27 + $0xf0] sm:$0xf]  ;;  %v1420_v39 = vld [vmem:[%s1820_s27 + $0xf4] sm:$0xf0]  ;;  %v1249_v44 = vor.u32 %v1404_v37, %v1248_v36 }
  0x5a   : > { %v1313_v45 = vor.u32 %v1420_v39, %v1312_v38 }
  0x68   : > { %670 = vmatmul.bf16.gmra.mxu0 %v1209_v48  ;;  %710 = vmatmul.bf16.gmra.mxu2 %v1273_v49  ;;  %v1897_v49 = vld [vmem:[%s2045_s2] ss:$0 sm:$0xff] }
  0x69   : > { %759 = vmatmul.bf16.gmra.mxu1 %v1213_v50  ;;  %799 = vmatmul.bf16.gmra.mxu3 %v1277_v51 }
  0x78   : > { %675 = vmatmul.bf16.gmra.mxu0 %v1217_v60  ;;  %715 = vmatmul.bf16.gmra.mxu2 %v1281_v61 }
  0x79   : > { %764 = vmatmul.bf16.gmra.mxu1 %v1221_v62  ;;  %804 = vmatmul.bf16.gmra.mxu3 %v1285_v63 }
  0x88   : > { %680 = vmatmul.bf16.gmra.mxu0 %v1225_v8  ;;  %720 = vmatmul.bf16.gmra.mxu2 %v1289_v9 }
  0x89   : > { %769 = vmatmul.bf16.gmra.mxu1 %v1229_v10  ;;  %809 = vmatmul.bf16.gmra.mxu3 %v1293_v11 }
  0x98   : > { %685 = vmatmul.bf16.gmra.mxu0 %v1233_v20  ;;  %725 = vmatmul.bf16.gmra.mxu2 %v1297_v21 }
  0x99   : > { %774 = vmatmul.bf16.gmra.mxu1 %v1237_v22  ;;  %814 = vmatmul.bf16.gmra.mxu3 %v1301_v23 }
  0xa8   : > { %690 = vmatmul.bf16.gmra.mxu0 %v1241_v32  ;;  %730 = vmatmul.bf16.gmra.mxu2 %v1305_v33 }
  0xa9   : > { %779 = vmatmul.bf16.gmra.mxu1 %v1245_v34  ;;  %819 = vmatmul.bf16.gmra.mxu3 %v1309_v35 }
  0xb8   : > { %695 = vmatmul.bf16.gmra.mxu0 %v1249_v44  ;;  %735 = vmatmul.bf16.gmra.mxu2 %v1313_v45 }
  0xb9   : > { %784 = vmatmul.bf16.gmra.mxu1 %v1253_v46  ;;  %824 = vmatmul.bf16.gmra.mxu3 %v1317_v47 }
  0xc5   : > { %v661_v48 = vpop.f32.mrf.mxu0 }
  0xc6   : > { %v750_v50 = vpop.f32.mrf.mxu1 }
  0xc7   : > { %v751_v51 = vadd.f32 %v750_v50, %v661_v48 }
  0xc9   : > { %v933_v53 = vmul.f32 %v1897_v49, %v751_v51 }
  0xcb   : > { %v969_v54 = vadd.f32 %v1902_v52, %v933_v53  ;;  %v701_v55 = vpop.f32.mrf.mxu2 }
  0xcc   : > { %v790_v56 = vpop.f32.mrf.mxu3 }
  0xcd   : > { %v1001_v57 = vmax.f32 %v969_v54, 0.0  ;;  %v791_v58 = vadd.f32 %v790_v56, %v701_v55  ;;  %v663_v59 = vpop.f32.mrf.mxu0 }
  0xce   : > { %v752_v60 = vpop.f32.mrf.mxu1 }
  0xcf   : > { %1033 = vst [vmem:[%s1908_s9] sm:$0xff] %v1001_v57  ;;  %v949_v61 = vmul.f32 %v1897_v49, %v791_v58  ;;  %v753_v62 = vadd.f32 %v752_v60, %v663_v59 }
  0xd1   : > { %v985_v63 = vadd.f32 %v1902_v52, %v949_v61  ;;  %v934_v0 = vmul.f32 %v1897_v49, %v753_v62 }
  0xd3   : > { %v1017_v1 = vmax.f32 %v985_v63, 0.0  ;;  %v970_v2 = vadd.f32 %v1902_v52, %v934_v0  ;;  %v703_v3 = vpop.f32.mrf.mxu2 }
  0xd4   : > { %v792_v4 = vpop.f32.mrf.mxu3 }
  0xd5   : > { %1049 = vst [vmem:[%s1908_s9 + $0x80] sm:$0xff] %v1017_v1  ;;  %v1002_v5 = vmax.f32 %v970_v2, 0.0  ;;  %v793_v6 = vadd.f32 %v792_v4, %v703_v3  ;;  %v666_v7 = vpop.f32.mrf.mxu0 }
  0xd6   : > { %v755_v8 = vpop.f32.mrf.mxu1 }
  0xd7   : > { %1034 = vst [vmem:[%s1908_s9 + $0x8] sm:$0xff] %v1002_v5  ;;  %v950_v9 = vmul.f32 %v1897_v49, %v793_v6  ;;  %v756_v10 = vadd.f32 %v755_v8, %v666_v7 }
  0xd9   : > { %v986_v11 = vadd.f32 %v1902_v52, %v950_v9  ;;  %v935_v12 = vmul.f32 %v1897_v49, %v756_v10 }
  0xdb   : > { %v1018_v13 = vmax.f32 %v986_v11, 0.0  ;;  %v971_v14 = vadd.f32 %v1902_v52, %v935_v12  ;;  %v706_v15 = vpop.f32.mrf.mxu2 }
  0xdc   : > { %v795_v16 = vpop.f32.mrf.mxu3 }
  0xdd   : > { %1050 = vst [vmem:[%s1908_s9 + $0x88] sm:$0xff] %v1018_v13  ;;  %v1003_v17 = vmax.f32 %v971_v14, 0.0  ;;  %v796_v18 = vadd.f32 %v795_v16, %v706_v15  ;;  %v668_v19 = vpop.f32.mrf.mxu0 }
  0xde   : > { %v757_v20 = vpop.f32.mrf.mxu1 }
  0xdf   : > { %1035 = vst [vmem:[%s1908_s9 + $0x10] sm:$0xff] %v1003_v17  ;;  %v951_v21 = vmul.f32 %v1897_v49, %v796_v18  ;;  %v758_v22 = vadd.f32 %v757_v20, %v668_v19 }
  0xe1   : > { %v987_v23 = vadd.f32 %v1902_v52, %v951_v21  ;;  %v936_v24 = vmul.f32 %v1897_v49, %v758_v22 }
  0xe3   : > { %v1019_v25 = vmax.f32 %v987_v23, 0.0  ;;  %v972_v26 = vadd.f32 %v1902_v52, %v936_v24  ;;  %v708_v27 = vpop.f32.mrf.mxu2 }
  0xe4   : > { %v797_v28 = vpop.f32.mrf.mxu3 }
  0xe5   : > { %1051 = vst [vmem:[%s1908_s9 + $0x90] sm:$0xff] %v1019_v25  ;;  %v1004_v29 = vmax.f32 %v972_v26, 0.0  ;;  %v798_v30 = vadd.f32 %v797_v28, %v708_v27  ;;  %v671_v31 = vpop.f32.mrf.mxu0 }
  0xe6   : > { %v760_v32 = vpop.f32.mrf.mxu1 }
  0xe7   : > { %1036 = vst [vmem:[%s1908_s9 + $0x18] sm:$0xff] %v1004_v29  ;;  %v952_v33 = vmul.f32 %v1897_v49, %v798_v30  ;;  %v761_v34 = vadd.f32 %v760_v32, %v671_v31 }
  0xe9   : > { %v988_v35 = vadd.f32 %v1902_v52, %v952_v33  ;;  %v937_v36 = vmul.f32 %v1897_v49, %v761_v34 }
  0xeb   : > { %v1020_v37 = vmax.f32 %v988_v35, 0.0  ;;  %v973_v38 = vadd.f32 %v1902_v52, %v937_v36  ;;  %v711_v39 = vpop.f32.mrf.mxu2 }
  0xec   : > { %v800_v40 = vpop.f32.mrf.mxu3 }
  0xed   : > { %1052 = vst [vmem:[%s1908_s9 + $0x98] sm:$0xff] %v1020_v37  ;;  %v1005_v41 = vmax.f32 %v973_v38, 0.0  ;;  %v801_v42 = vadd.f32 %v800_v40, %v711_v39  ;;  %v673_v43 = vpop.f32.mrf.mxu0 }
  0xee   : > { %v762_v44 = vpop.f32.mrf.mxu1 }
  0xef   : > { %1037 = vst [vmem:[%s1908_s9 + $0x20] sm:$0xff] %v1005_v41  ;;  %v953_v45 = vmul.f32 %v1897_v49, %v801_v42  ;;  %v763_v46 = vadd.f32 %v762_v44, %v673_v43 }
  0xf1   : > { %v989_v47 = vadd.f32 %v1902_v52, %v953_v45  ;;  %v938_v48 = vmul.f32 %v1897_v49, %v763_v46 }
  0xf3   : > { %v1021_v50 = vmax.f32 %v989_v47, 0.0  ;;  %v974_v51 = vadd.f32 %v1902_v52, %v938_v48  ;;  %v713_v53 = vpop.f32.mrf.mxu2 }
  0xf4   : > { %v802_v54 = vpop.f32.mrf.mxu3 }
  0xf5   : > { %1053 = vst [vmem:[%s1908_s9 + $0xa0] sm:$0xff] %v1021_v50  ;;  %v1006_v55 = vmax.f32 %v974_v51, 0.0  ;;  %v803_v56 = vadd.f32 %v802_v54, %v713_v53  ;;  %v676_v57 = vpop.f32.mrf.mxu0 }
  0xf6   : > { %v765_v58 = vpop.f32.mrf.mxu1 }
  0xf7   : > { %1038 = vst [vmem:[%s1908_s9 + $0x28] sm:$0xff] %v1006_v55  ;;  %v954_v59 = vmul.f32 %v1897_v49, %v803_v56  ;;  %v766_v60 = vadd.f32 %v765_v58, %v676_v57 }
  0xf9   : > { %v990_v61 = vadd.f32 %v1902_v52, %v954_v59  ;;  %v939_v62 = vmul.f32 %v1897_v49, %v766_v60 }
  0xfb   : > { %v1022_v63 = vmax.f32 %v990_v61, 0.0  ;;  %v975_v0 = vadd.f32 %v1902_v52, %v939_v62  ;;  %v716_v1 = vpop.f32.mrf.mxu2 }
  0xfc   : > { %v805_v2 = vpop.f32.mrf.mxu3 }
  0xfd   : > { %1054 = vst [vmem:[%s1908_s9 + $0xa8] sm:$0xff] %v1022_v63  ;;  %v1007_v3 = vmax.f32 %v975_v0, 0.0  ;;  %v806_v4 = vadd.f32 %v805_v2, %v716_v1  ;;  %v678_v5 = vpop.f32.mrf.mxu0 }
  0xfe   : > { %v767_v6 = vpop.f32.mrf.mxu1 }
  0xff   : > { %1039 = vst [vmem:[%s1908_s9 + $0x30] sm:$0xff] %v1007_v3  ;;  %v955_v7 = vmul.f32 %v1897_v49, %v806_v4  ;;  %v768_v8 = vadd.f32 %v767_v6, %v678_v5 }
 0x101   : > { %v991_v9 = vadd.f32 %v1902_v52, %v955_v7  ;;  %v940_v10 = vmul.f32 %v1897_v49, %v768_v8 }
 0x103   : > { %v1023_v11 = vmax.f32 %v991_v9, 0.0  ;;  %v976_v12 = vadd.f32 %v1902_v52, %v940_v10  ;;  %v718_v13 = vpop.f32.mrf.mxu2 }
 0x104   : > { %v807_v14 = vpop.f32.mrf.mxu3 }
 0x105   : > { %1055 = vst [vmem:[%s1908_s9 + $0xb0] sm:$0xff] %v1023_v11  ;;  %v1008_v15 = vmax.f32 %v976_v12, 0.0  ;;  %v808_v16 = vadd.f32 %v807_v14, %v718_v13  ;;  %v681_v17 = vpop.f32.mrf.mxu0 }
 0x106   : > { %v770_v18 = vpop.f32.mrf.mxu1 }
 0x107   : > { %1040 = vst [vmem:[%s1908_s9 + $0x38] sm:$0xff] %v1008_v15  ;;  %v956_v19 = vmul.f32 %v1897_v49, %v808_v16  ;;  %v771_v20 = vadd.f32 %v770_v18, %v681_v17 }
 0x109   : > { %v992_v21 = vadd.f32 %v1902_v52, %v956_v19  ;;  %v941_v22 = vmul.f32 %v1897_v49, %v771_v20 }
 0x10b   : > { %v1024_v23 = vmax.f32 %v992_v21, 0.0  ;;  %v977_v24 = vadd.f32 %v1902_v52, %v941_v22  ;;  %v721_v25 = vpop.f32.mrf.mxu2 }
 0x10c   : > { %v810_v26 = vpop.f32.mrf.mxu3 }
 0x10d   : > { %1056 = vst [vmem:[%s1908_s9 + $0xb8] sm:$0xff] %v1024_v23  ;;  %v1009_v27 = vmax.f32 %v977_v24, 0.0  ;;  %v811_v28 = vadd.f32 %v810_v26, %v721_v25  ;;  %v683_v29 = vpop.f32.mrf.mxu0 }
 0x10e   : > { %v772_v30 = vpop.f32.mrf.mxu1 }
 0x10f   : > { %1041 = vst [vmem:[%s1908_s9 + $0x40] sm:$0xff] %v1009_v27  ;;  %v957_v31 = vmul.f32 %v1897_v49, %v811_v28  ;;  %v773_v32 = vadd.f32 %v772_v30, %v683_v29 }
 0x111   : > { %v993_v33 = vadd.f32 %v1902_v52, %v957_v31  ;;  %v942_v34 = vmul.f32 %v1897_v49, %v773_v32 }
 0x113   : > { %v1025_v35 = vmax.f32 %v993_v33, 0.0  ;;  %v978_v36 = vadd.f32 %v1902_v52, %v942_v34  ;;  %v723_v37 = vpop.f32.mrf.mxu2 }
 0x114   : > { %v812_v38 = vpop.f32.mrf.mxu3 }
 0x115   : > { %1057 = vst [vmem:[%s1908_s9 + $0xc0] sm:$0xff] %v1025_v35  ;;  %v1010_v39 = vmax.f32 %v978_v36, 0.0  ;;  %v813_v40 = vadd.f32 %v812_v38, %v723_v37  ;;  %v686_v41 = vpop.f32.mrf.mxu0 }
 0x116   : > { %v775_v42 = vpop.f32.mrf.mxu1 }
 0x117   : > { %1042 = vst [vmem:[%s1908_s9 + $0x48] sm:$0xff] %v1010_v39  ;;  %v958_v43 = vmul.f32 %v1897_v49, %v813_v40  ;;  %v776_v44 = vadd.f32 %v775_v42, %v686_v41 }
 0x119   : > { %v994_v45 = vadd.f32 %v1902_v52, %v958_v43  ;;  %v943_v46 = vmul.f32 %v1897_v49, %v776_v44 }
 0x11b   : > { %v1026_v47 = vmax.f32 %v994_v45, 0.0  ;;  %v979_v48 = vadd.f32 %v1902_v52, %v943_v46  ;;  %v726_v50 = vpop.f32.mrf.mxu2 }
 0x11c   : > { %v815_v51 = vpop.f32.mrf.mxu3 }
 0x11d   : > { %1058 = vst [vmem:[%s1908_s9 + $0xc8] sm:$0xff] %v1026_v47  ;;  %v1011_v53 = vmax.f32 %v979_v48, 0.0  ;;  %v816_v54 = vadd.f32 %v815_v51, %v726_v50  ;;  %v688_v55 = vpop.f32.mrf.mxu0 }
 0x11e   : > { %v777_v56 = vpop.f32.mrf.mxu1 }
 0x11f   : > { %1043 = vst [vmem:[%s1908_s9 + $0x50] sm:$0xff] %v1011_v53  ;;  %v959_v57 = vmul.f32 %v1897_v49, %v816_v54  ;;  %v778_v58 = vadd.f32 %v777_v56, %v688_v55 }
 0x121   : > { %v995_v59 = vadd.f32 %v1902_v52, %v959_v57  ;;  %v944_v60 = vmul.f32 %v1897_v49, %v778_v58 }
 0x123   : > { %v1027_v61 = vmax.f32 %v995_v59, 0.0  ;;  %v980_v62 = vadd.f32 %v1902_v52, %v944_v60  ;;  %v728_v63 = vpop.f32.mrf.mxu2 }
 0x124   : > { %v817_v0 = vpop.f32.mrf.mxu3 }
 0x125   : > { %1059 = vst [vmem:[%s1908_s9 + $0xd0] sm:$0xff] %v1027_v61  ;;  %v1012_v1 = vmax.f32 %v980_v62, 0.0  ;;  %v818_v2 = vadd.f32 %v817_v0, %v728_v63  ;;  %v691_v3 = vpop.f32.mrf.mxu0 }
 0x126   : > { %v780_v4 = vpop.f32.mrf.mxu1 }
 0x127   : > { %1044 = vst [vmem:[%s1908_s9 + $0x58] sm:$0xff] %v1012_v1  ;;  %v960_v5 = vmul.f32 %v1897_v49, %v818_v2  ;;  %v781_v6 = vadd.f32 %v780_v4, %v691_v3 }
 0x129   : > { %v996_v7 = vadd.f32 %v1902_v52, %v960_v5  ;;  %v945_v8 = vmul.f32 %v1897_v49, %v781_v6 }
 0x12b   : > { %v1028_v9 = vmax.f32 %v996_v7, 0.0  ;;  %v981_v10 = vadd.f32 %v1902_v52, %v945_v8  ;;  %v731_v11 = vpop.f32.mrf.mxu2 }
 0x12c   : > { %v820_v12 = vpop.f32.mrf.mxu3 }
 0x12d   : > { %1060 = vst [vmem:[%s1908_s9 + $0xd8] sm:$0xff] %v1028_v9  ;;  %v1013_v13 = vmax.f32 %v981_v10, 0.0  ;;  %v821_v14 = vadd.f32 %v820_v12, %v731_v11  ;;  %v693_v15 = vpop.f32.mrf.mxu0 }
 0x12e   : > { %v782_v16 = vpop.f32.mrf.mxu1 }
 0x12f   : > { %1045 = vst [vmem:[%s1908_s9 + $0x60] sm:$0xff] %v1013_v13  ;;  %v961_v17 = vmul.f32 %v1897_v49, %v821_v14  ;;  %v783_v18 = vadd.f32 %v782_v16, %v693_v15 }
 0x131   : > { %v997_v19 = vadd.f32 %v1902_v52, %v961_v17  ;;  %v946_v20 = vmul.f32 %v1897_v49, %v783_v18 }
 0x133   : > { %v1029_v21 = vmax.f32 %v997_v19, 0.0  ;;  %v982_v22 = vadd.f32 %v1902_v52, %v946_v20  ;;  %v733_v23 = vpop.f32.mrf.mxu2 }
 0x134   : > { %v822_v24 = vpop.f32.mrf.mxu3 }
 0x135   : > { %1061 = vst [vmem:[%s1908_s9 + $0xe0] sm:$0xff] %v1029_v21  ;;  %v1014_v25 = vmax.f32 %v982_v22, 0.0  ;;  %v823_v26 = vadd.f32 %v822_v24, %v733_v23  ;;  %v696_v27 = vpop.f32.mrf.mxu0 }
 0x136   : > { %v785_v28 = vpop.f32.mrf.mxu1 }
 0x137   : > { %1046 = vst [vmem:[%s1908_s9 + $0x68] sm:$0xff] %v1014_v25  ;;  %v962_v29 = vmul.f32 %v1897_v49, %v823_v26  ;;  %v786_v30 = vadd.f32 %v785_v28, %v696_v27 }
 0x139   : > { %v998_v31 = vadd.f32 %v1902_v52, %v962_v29  ;;  %v947_v32 = vmul.f32 %v1897_v49, %v786_v30 }
 0x13b   : > { %v1030_v33 = vmax.f32 %v998_v31, 0.0  ;;  %v983_v34 = vadd.f32 %v1902_v52, %v947_v32  ;;  %v736_v35 = vpop.f32.mrf.mxu2 }
 0x13c   : > { %v825_v36 = vpop.f32.mrf.mxu3 }
 0x13d   : > { %1062 = vst [vmem:[%s1908_s9 + $0xe8] sm:$0xff] %v1030_v33  ;;  %v1015_v37 = vmax.f32 %v983_v34, 0.0  ;;  %v826_v38 = vadd.f32 %v825_v36, %v736_v35  ;;  %v698_v39 = vpop.f32.mrf.mxu0 }
 0x13e   : > { %v787_v40 = vpop.f32.mrf.mxu1 }
 0x13f   : > { %1047 = vst [vmem:[%s1908_s9 + $0x70] sm:$0xff] %v1015_v37  ;;  %v963_v41 = vmul.f32 %v1897_v49, %v826_v38  ;;  %v788_v42 = vadd.f32 %v787_v40, %v698_v39 }
 0x141   : > { %v999_v43 = vadd.f32 %v1902_v52, %v963_v41  ;;  %v948_v44 = vmul.f32 %v1897_v49, %v788_v42 }
 0x143   : > { %v1031_v45 = vmax.f32 %v999_v43, 0.0  ;;  %v984_v46 = vadd.f32 %v1902_v52, %v948_v44  ;;  %v738_v47 = vpop.f32.mrf.mxu2 }
 0x144   : > { %v827_v48 = vpop.f32.mrf.mxu3 }
 0x145   : > { %1063 = vst [vmem:[%s1908_s9 + $0xf0] sm:$0xff] %v1031_v45  ;;  %v1016_v50 = vmax.f32 %v984_v46, 0.0  ;;  %v828_v51 = vadd.f32 %v827_v48, %v738_v47 }
 0x147   : > { %1048 = vst [vmem:[%s1908_s9 + $0x78] sm:$0xff] %v1016_v50  ;;  %v964_v53 = vmul.f32 %v1897_v49, %v828_v51 }
 0x149   : > { %v1000_v54 = vadd.f32 %v1902_v52, %v964_v53 }
 0x14b   : > { %v1032_v55 = vmax.f32 %v1000_v54, 0.0 }
 0x14d   : > { %1064 = vst [vmem:[%s1908_s9 + $0xf8] sm:$0xff] %v1032_v55 }
 0x14e   : > { %1622 = shalt.err (!%p1619_p0)
}
 0x14f   : > { %s1688_s10 = smov 128   ;;  %s1689_s23 = smov 8  }
 0x150   : > { %1460 = dma.vmem_to_hbm [thread:$0]  (%p1794_p5), %s1079_s5, 4096, %s1081_s18, %s1066_s6, %s1688_s10, %s1688_s10, %s1689_s23  }
 0x151 PF: > { %s1095_s25 = sand.u32 1, %s1661_s15   ;;  %p1471_p3 = pnand %p1181_p11, %p1764_p6 }
 0x152   : > { %s1096_s30 = scalar_lea.sflag [#allocation5], %s1095_s25 }
 0x153   : > { %p1472_p7 = pneg %p1471_p3 }
 0x155   : > { %1656 = dma.done.wait (%p1472_p7), %s1096_s30, 4096  }
 0x156   : > { %1658 = vsyncadd (%p1472_p7), %s1096_s30, 4294963200  ;;  %s21_s20 = sadd.s32 1, %s1681_s20   ;;  %s2059_s12 = sld [smem:[#allocation12_spill]] }
 0x157   : > { %p18_p9 = scmp.ge.s32.totalorder %s21_s20, 4   ;;  %s2060_s15 = smov %s1665_s16 }
 0x158   : > { %s2061_s16 = smov %s1669_s17  ;;  %s2062_s17 = smov %s1803_s22 }
 0x159   : > { %s2063_s18 = smov %s1677_s19  ;;  %20 = sbr.rel (!%p18_p9) target bundleno = 9 (0x9), region = 94 }
 0x15c   : > { %s2064_s19 = smov %s2059_s12 }
 0x15e   :  { %1102 = vsyncpa [#allocation4], 1 }
 0x15f   :  { %1104 = vsyncpa [#allocation4 + $0x1], 1 }
 0x160   :  { %1105 = vsyncpa [#allocation7], 1 }
 0x161   :  { %1106 = vsyncpa [#allocation5], 1 }
 0x162   :  { %1108 = vsyncpa [#allocation5 + $0x1], 1 }

</bundles_post_ra>
